<compile_context>
chip_gen: v7x
topology: tpu7x:2x2x1
jax: 0.10.0
libtpu: 0.0.40
codegen_flags: <defaults>
</compile_context>

<pallas_src>
import functools

import jax
import jax.numpy as jnp
from jax.experimental import pallas as pl
from jax.experimental.pallas import tpu as pltpu


# ----------------------------------------------------------------------------
# Kernel
# ----------------------------------------------------------------------------
def _ime_kernel(NE, OF, has_past, *refs):
    """Fused [experts | gate] matmul + exact softmax, one batch tile per grid step."""
    if has_past:
        x_ref, past_ref, w_ref, b_ref, gwp_ref, eo_ref, wt_ref, reg_ref = refs
    else:
        x_ref, w_ref, b_ref, eo_ref, wt_ref, reg_ref = refs

    NEO = NE * OF                      # flat expert width (OF-major, NE-minor), lane offset 0

    x = x_ref[...]
    if x.dtype != w_ref.dtype:
        x = x.astype(w_ref.dtype)      # in-kernel cast, hidden under the input DMA

    # Single fused MXU issue: columns = [experts (NEO) | gate_x (NE+OF)], f32 accumulation.
    y = jnp.dot(x, w_ref[...], preferred_element_type=jnp.float32) + b_ref[...]

    # Dominant store: experts slab is at offset 0 in both y and its own output -> lane-dense.
    eo_ref[...] = y[:, :NEO].astype(eo_ref.dtype)

    gate = y[:, NEO:]                                                  # (TB, NE+OF)
    if has_past:
        p = past_ref[...]
        if p.dtype != gwp_ref.dtype:
            p = p.astype(gwp_ref.dtype)
        gate = gate + jnp.dot(p, gwp_ref[...], preferred_element_type=jnp.float32)

    # Exact softmax over the NE assignment logits (f32 math; exact divide -- HBM-bound kernel).
    logits = gate[:, :NE]
    m = jnp.max(logits, axis=1, keepdims=True)
    e = jnp.exp(logits - m)
    wt_ref[...] = (e / jnp.sum(e, axis=1, keepdims=True)).astype(wt_ref.dtype)
    reg_ref[...] = gate[:, NE:].astype(reg_ref.dtype)


# ----------------------------------------------------------------------------
# Parameter handling
# ----------------------------------------------------------------------------
def init_params(key, num_experts, input_features, output_features):
    """Canonical params, nn.Linear-style init (uniform +-1/sqrt(fan_in))."""
    NE, IF, OF = num_experts, input_features, output_features
    kgw, kgb, kew, keb = jax.random.split(key, 4)

    fan_g = IF + NE
    kg = 1.0 / jnp.sqrt(fan_g)
    gate_w = jax.random.uniform(kgw, (fan_g, NE + OF), jnp.float32, -kg, kg)
    gate_b = jax.random.uniform(kgb, (NE + OF,), jnp.float32, -kg, kg)

    ke = 1.0 / jnp.sqrt(IF)
    expert_w = jax.random.uniform(kew, (NE, IF, OF), jnp.float32, -ke, ke)
    expert_b = jax.random.uniform(keb, (NE, OF), jnp.float32, -ke, ke)
    return {"gate_w": gate_w, "gate_b": gate_b,
            "expert_w": expert_w, "expert_b": expert_b}


def pack_params(params, num_experts, input_features, output_features, *, dtype=jnp.float32):
    """Pack canonical params into the fused, experts-first kernel layout (done once)."""
    NE, IF, OF = num_experts, input_features, output_features
    gw, gb = params["gate_w"], params["gate_b"]            # (IF+NE, NE+OF), (NE+OF,)
    ew, eb = params["expert_w"], params["expert_b"]        # (NE, IF, OF),  (NE, OF)

    # Permute expert columns to (OF-major, NE-minor) so flat output -> (B, OF, NE) is a reshape.
    ew_perm = jnp.transpose(ew, (1, 2, 0)).reshape(IF, OF * NE)       # [i, o*NE+e] = ew[e,i,o]
    eb_perm = jnp.transpose(eb, (1, 0)).reshape(1, OF * NE)

    # Experts FIRST (lane offset 0), gate columns at the tail.
    w_fused = jnp.concatenate([ew_perm, gw[:IF]], axis=1).astype(dtype)      # (IF, NEO+NE+OF)
    b_fused = jnp.concatenate([eb_perm, gb.reshape(1, -1)], axis=1).astype(jnp.float32)
    gw_past = gw[IF:].astype(dtype)                                          # (NE, NE+OF)
    return {"w_fused": w_fused, "b_fused": b_fused, "gw_past": gw_past}


# ----------------------------------------------------------------------------
# Tiling / VMEM planning
# ----------------------------------------------------------------------------
def _device_info():
    """(physical VMEM bytes per TensorCore, number of TensorCores sharing the grid)."""
    try:
        kind = jax.devices()[0].device_kind.lower()
    except Exception:
        kind = ""
    if "v7" in kind:
        return 64 << 20, 2          # v7x: 64 MiB VMEM per TC, 2 TCs per chip
    return 128 << 20, 1             # v5e / v6e (and default)


def _plan_tiles(B, in_row_bytes, out_row_bytes, weight_bytes, tile_batch=None):
    """Pick batch tile, grid length and a shape-derived vmem_limit_bytes."""
    phys_vmem, num_cores = _device_info()
    if tile_batch is not None:
        tb = int(tile_batch)
    else:
        budget = int(phys_vmem * 0.7)                     # headroom for compiler scratch
        stream_row = in_row_bytes + out_row_bytes
        # 2x: streamed blocks are double-buffered; weights budgeted twice as well.
        cap = (budget - 2 * weight_bytes) // max(1, 2 * stream_row)
        tb = int(min(2048, max(16, cap)))                 # HBM roofline plateaus ~512-2048
        # >=2 grid steps per core (v7x megacore split + DMA pipeline overlap) when B allows.
        min_steps = 2 * num_cores
        tb = min(tb, max(16, -(-B // min_steps)))
    if tb >= B:
        tb, grid = B, 1                                   # single full block, no masking
    else:
        tb = max(16, (tb // 16) * 16)                     # sublane multiple for f32 and bf16
        grid = pl.cdiv(B, tb)                             # last block masked on store
    need = 2 * tb * (in_row_bytes + out_row_bytes) + 2 * weight_bytes + (4 << 20)
    vmem_limit = int(min(phys_vmem * 0.9, max(need, 32 << 20)))
    return tb, grid, vmem_limit


# ----------------------------------------------------------------------------
# Wrapper
# ----------------------------------------------------------------------------
def ime_tabular_forward(inputs, past_values, packed,
                        num_experts, input_features, output_features,
                        *, out_dtype=jnp.float32, tile_batch=None):
    """Returns (expert_outputs (B,OF,NE), weights (B,NE,1), reg_out (B,OF))."""
    B = inputs.shape[0]
    NE, IF, OF = num_experts, input_features, output_features
    NEO = NE * OF
    has_past = past_values is not None

    w_fused = packed["w_fused"]                           # (IF, NEO + NE + OF), pack dtype
    b_fused = packed["b_fused"]                           # (1,  NEO + NE + OF), f32
    gw_past = packed["gw_past"] if has_past else None     # (NE, NE + OF)

    out_itemsize = jnp.dtype(out_dtype).itemsize
    in_row = IF * inputs.dtype.itemsize
    if has_past:
        in_row += NE * past_values.dtype.itemsize
    out_row = (NEO + NE + OF) * out_itemsize
    weight_bytes = (w_fused.size * w_fused.dtype.itemsize
                    + b_fused.size * b_fused.dtype.itemsize
                    + (gw_past.size * gw_past.dtype.itemsize if has_past else 0))

    TB, grid_steps, vmem_limit = _plan_tiles(B, in_row, out_row, weight_bytes, tile_batch)

    args = [inputs]
    in_specs = [pl.BlockSpec((TB, IF), lambda b: (b, 0))]
    if has_past:
        args.append(past_values)
        in_specs.append(pl.BlockSpec((TB, NE), lambda b: (b, 0)))
    args += [w_fused, b_fused]
    in_specs += [
        pl.BlockSpec(w_fused.shape, lambda b: (0, 0)),    # constant index_map: VMEM-resident
        pl.BlockSpec(b_fused.shape, lambda b: (0, 0)),
    ]
    if has_past:
        args.append(gw_past)
        in_specs.append(pl.BlockSpec(gw_past.shape, lambda b: (0, 0)))

    out_shape = (jax.ShapeDtypeStruct((B, NEO), out_dtype),   # experts (lane-dense stream)
                 jax.ShapeDtypeStruct((B, NE), out_dtype),    # softmax weights
                 jax.ShapeDtypeStruct((B, OF), out_dtype))    # regression head
    out_specs = (pl.BlockSpec((TB, NEO), lambda b: (b, 0)),
                 pl.BlockSpec((TB, NE), lambda b: (b, 0)),
                 pl.BlockSpec((TB, OF), lambda b: (b, 0)))

    kernel = functools.partial(_ime_kernel, NE, OF, has_past)

    eo_flat, weights, reg_out = pl.pallas_call(
        kernel,
        grid=(grid_steps,),
        in_specs=in_specs,
        out_specs=out_specs,
        out_shape=out_shape,
        compiler_params=pltpu.CompilerParams(
            dimension_semantics=("parallel",),
            vmem_limit_bytes=vmem_limit),
    )(*args)

    expert_outputs = eo_flat.reshape(B, OF, NE)           # pure reshape (OF-major, NE-minor)
    weights = weights[:, :, None]                         # (B, NE, 1), softmax over dim=1
    return expert_outputs, weights, reg_out


# ----------------------------------------------------------------------------
# Pure-JAX reference mirroring the PyTorch forward
# ----------------------------------------------------------------------------
def _reference(inputs, past_values, params, NE, IF, OF):
    B = inputs.shape[0]
    if past_values is None:
        past_values = jnp.zeros((B, NE), inputs.dtype)
    gate_inputs = jnp.concatenate((inputs, past_values), axis=1)
    gated = gate_inputs @ params["gate_w"] + params["gate_b"]     # (B, NE+OF)
    logits = gated[:, :-OF]
    reg_out = gated[:, -OF:]
    weights = jax.nn.softmax(logits, axis=1)[:, :, None]          # (B, NE, 1)
    eo = jnp.stack([inputs @ params["expert_w"][e] + params["expert_b"][e]
                    for e in range(NE)], axis=2)                  # (B, OF, NE)
    return eo, weights, reg_out


# ----------------------------------------------------------------------------
# Test
# ----------------------------------------------------------------------------
if __name__ == "__main__":
    NUM_EXPERTS = 3
    INPUT_FEATURES = 4
    OUTPUT_FEATURES = 2
    BATCH = 8

    key = jax.random.PRNGKey(0)
    k_params, k_x, k_p, k_x2, k_p2 = jax.random.split(key, 5)
    params = init_params(k_params, NUM_EXPERTS, INPUT_FEATURES, OUTPUT_FEATURES)
    packed = pack_params(params, NUM_EXPERTS, INPUT_FEATURES, OUTPUT_FEATURES)
    x = jax.random.normal(k_x, (BATCH, INPUT_FEATURES), jnp.float32)
    past = jax.random.normal(k_p, (BATCH, NUM_EXPERTS), jnp.float32)

    # --- f32 path, past_values=None (module default) -------------------------
    eo, w, r = ime_tabular_forward(x, None, packed,
                                   NUM_EXPERTS, INPUT_FEATURES, OUTPUT_FEATURES)
    jax.block_until_ready((eo, w, r))
    ref_eo, ref_w, ref_r = _reference(x, None, params,
                                      NUM_EXPERTS, INPUT_FEATURES, OUTPUT_FEATURES)
    assert eo.shape == (BATCH, OUTPUT_FEATURES, NUM_EXPERTS)
    assert w.shape == (BATCH, NUM_EXPERTS, 1)
    assert r.shape == (BATCH, OUTPUT_FEATURES)
    assert jnp.allclose(eo, ref_eo, atol=1e-4)
    assert jnp.allclose(w, ref_w, atol=1e-4)      # exact softmax divide now
    assert jnp.allclose(r, ref_r, atol=1e-4)

    # --- f32 path with past_values -------------------------------------------
    eo2, w2, r2 = ime_tabular_forward(x, past, packed,
                                      NUM_EXPERTS, INPUT_FEATURES, OUTPUT_FEATURES)
    jax.block_until_ready((eo2, w2, r2))
    ref_eo2, ref_w2, ref_r2 = _reference(x, past, params,
                                         NUM_EXPERTS, INPUT_FEATURES, OUTPUT_FEATURES)
    assert jnp.allclose(eo2, ref_eo2, atol=1e-4)
    assert jnp.allclose(w2, ref_w2, atol=1e-4)
    assert jnp.allclose(r2, ref_r2, atol=1e-4)

    # --- ragged batch (B not a multiple of the tile): masked last block, no padding
    B2 = 40
    x2 = jax.random.normal(k_x2, (B2, INPUT_FEATURES), jnp.float32)
    p2 = jax.random.normal(k_p2, (B2, NUM_EXPERTS), jnp.float32)
    eo3, w3, r3 = ime_tabular_forward(x2, p2, packed,
                                      NUM_EXPERTS, INPUT_FEATURES, OUTPUT_FEATURES,
                                      tile_batch=16)
    jax.block_until_ready((eo3, w3, r3))
    ref_eo3, ref_w3, ref_r3 = _reference(x2, p2, params,
                                         NUM_EXPERTS, INPUT_FEATURES, OUTPUT_FEATURES)
    assert jnp.allclose(eo3, ref_eo3, atol=1e-4)
    assert jnp.allclose(w3, ref_w3, atol=1e-4)
    assert jnp.allclose(r3, ref_r3, atol=1e-4)

    # --- opt-in bf16 weights + bf16 outputs (halves HBM bytes on both streams) ---
    packed_bf16 = pack_params(params, NUM_EXPERTS, INPUT_FEATURES, OUTPUT_FEATURES,
                              dtype=jnp.bfloat16)
    eo4, w4, r4 = ime_tabular_forward(x, past, packed_bf16,
                                      NUM_EXPERTS, INPUT_FEATURES, OUTPUT_FEATURES,
                                      out_dtype=jnp.bfloat16)
    jax.block_until_ready((eo4, w4, r4))
    assert jnp.allclose(eo4.astype(jnp.float32), ref_eo2, atol=1e-1)
    assert jnp.allclose(w4.astype(jnp.float32), ref_w2, atol=1e-1)
    assert jnp.allclose(r4.astype(jnp.float32), ref_r2, atol=1e-1)

    print("KERNEL_OK")
</pallas_src>

<mosaic_0001>
module attributes {stable_mosaic.version = 11 : i64} {
  func.func @_ime_kernel(%arg0: i32, %arg1: memref<8x4xf32, #tpu.memory_space<vmem>>, %arg2: memref<4x11xf32, #tpu.memory_space<vmem>>, %arg3: memref<1x11xf32, #tpu.memory_space<vmem>>, %arg4: memref<8x6xf32, #tpu.memory_space<vmem>>, %arg5: memref<8x3xf32, #tpu.memory_space<vmem>>, %arg6: memref<8x2xf32, #tpu.memory_space<vmem>>) attributes {dimension_semantics = [#tpu.dimension_semantics<parallel>], iteration_bounds = array<i64: 1>, scalar_prefetch = 0 : i64, scratch_operands = 0 : i64, tpu.core_type = #tpu.core_type<tc>, window_params = [{transform_indices = @transform_0, window_bounds = array<i64: 8, 4>}, {pipeline_mode = #tpu.pipeline_mode<synchronous>, transform_indices = @transform_1, window_bounds = array<i64: 4, 11>}, {pipeline_mode = #tpu.pipeline_mode<synchronous>, transform_indices = @transform_2, window_bounds = array<i64: 1, 11>}, {transform_indices = @transform_3, window_bounds = array<i64: 8, 6>}, {transform_indices = @transform_4, window_bounds = array<i64: 8, 3>}, {transform_indices = @transform_5, window_bounds = array<i64: 8, 2>}]} {
    %c0 = arith.constant 0 : index
    %c0_0 = arith.constant 0 : index
    %0 = vector.load %arg1[%c0, %c0_0] : memref<8x4xf32, #tpu.memory_space<vmem>>, vector<8x4xf32>
    %c0_1 = arith.constant 0 : index
    %c0_2 = arith.constant 0 : index
    %1 = vector.load %arg2[%c0_1, %c0_2] : memref<4x11xf32, #tpu.memory_space<vmem>>, vector<4x11xf32>
    %cst = arith.constant dense<0.000000e+00> : vector<8x11xf32>
    %2 = tpu.matmul %0, %1, %cst {dimension_numbers = #tpu.dot_dimension_numbers<[1], [0], [0], [1], [0, 0, 1, 1], [], []>} : vector<8x4xf32>, vector<4x11xf32>, vector<8x11xf32> -> vector<8x11xf32>
    %c0_3 = arith.constant 0 : index
    %c0_4 = arith.constant 0 : index
    %3 = vector.load %arg3[%c0_3, %c0_4] : memref<1x11xf32, #tpu.memory_space<vmem>>, vector<1x11xf32>
    %4 = vector.broadcast %3 : vector<1x11xf32> to vector<8x11xf32>
    %5 = arith.addf %2, %4 : vector<8x11xf32>
    %6 = vector.extract_strided_slice %5 {offsets = [0, 0], sizes = [8, 6], strides = [1, 1]} : vector<8x11xf32> to vector<8x6xf32>
    %c0_5 = arith.constant 0 : index
    %c0_6 = arith.constant 0 : index
    %7 = vector.load %arg4[%c0_5, %c0_6] : memref<8x6xf32, #tpu.memory_space<vmem>>, vector<8x6xf32>
    tpu.vector_store %arg4[%c0_5, %c0_6], %6 {strides = array<i32>} : memref<8x6xf32, #tpu.memory_space<vmem>>, vector<8x6xf32>,
    %8 = vector.extract_strided_slice %5 {offsets = [0, 6], sizes = [8, 5], strides = [1, 1]} : vector<8x11xf32> to vector<8x5xf32>
    %9 = vector.extract_strided_slice %8 {offsets = [0, 0], sizes = [8, 3], strides = [1, 1]} : vector<8x5xf32> to vector<8x3xf32>
    %cst_7 = arith.constant dense<0xFF800000> : vector<8xf32>
    %10 = vector.multi_reduction <maximumf>, %9, %cst_7 [1] : vector<8x3xf32> to vector<8xf32>
    %11 = vector.shape_cast %10 : vector<8xf32> to vector<8x1xf32>
    %12 = vector.broadcast %11 : vector<8x1xf32> to vector<8x3xf32>
    %13 = arith.subf %9, %12 : vector<8x3xf32>
    %14 = math.exp %13 : vector<8x3xf32>
    %cst_8 = arith.constant dense<0.000000e+00> : vector<8xf32>
    %15 = vector.multi_reduction <add>, %14, %cst_8 [1] : vector<8x3xf32> to vector<8xf32>
    %16 = vector.shape_cast %15 : vector<8xf32> to vector<8x1xf32>
    %17 = vector.broadcast %16 : vector<8x1xf32> to vector<8x3xf32>
    %18 = arith.divf %14, %17 : vector<8x3xf32>
    %c0_9 = arith.constant 0 : index
    %c0_10 = arith.constant 0 : index
    %19 = vector.load %arg5[%c0_9, %c0_10] : memref<8x3xf32, #tpu.memory_space<vmem>>, vector<8x3xf32>
    tpu.vector_store %arg5[%c0_9, %c0_10], %18 {strides = array<i32>} : memref<8x3xf32, #tpu.memory_space<vmem>>, vector<8x3xf32>,
    %20 = vector.extract_strided_slice %8 {offsets = [0, 3], sizes = [8, 2], strides = [1, 1]} : vector<8x5xf32> to vector<8x2xf32>
    %c0_11 = arith.constant 0 : index
    %c0_12 = arith.constant 0 : index
    %21 = vector.load %arg6[%c0_11, %c0_12] : memref<8x2xf32, #tpu.memory_space<vmem>>, vector<8x2xf32>
    tpu.vector_store %arg6[%c0_11, %c0_12], %20 {strides = array<i32>} : memref<8x2xf32, #tpu.memory_space<vmem>>, vector<8x2xf32>,
    return
  }
  func.func @transform_0(%arg0: i32) -> (i32, i32) {
    %c0_i32 = arith.constant 0 : i32
    %c0_i32_0 = arith.constant 0 : i32
    return %arg0, %c0_i32 : i32, i32
  }
  func.func @transform_1(%arg0: i32) -> (i32, i32) {
    %c0_i32 = arith.constant 0 : i32
    %c0_i32_0 = arith.constant 0 : i32
    %c0_i32_1 = arith.constant 0 : i32
    return %c0_i32, %c0_i32_0 : i32, i32
  }
  func.func @transform_2(%arg0: i32) -> (i32, i32) {
    %c0_i32 = arith.constant 0 : i32
    %c0_i32_0 = arith.constant 0 : i32
    %c0_i32_1 = arith.constant 0 : i32
    return %c0_i32, %c0_i32_0 : i32, i32
  }
  func.func @transform_3(%arg0: i32) -> (i32, i32) {
    %c0_i32 = arith.constant 0 : i32
    %c0_i32_0 = arith.constant 0 : i32
    return %arg0, %c0_i32 : i32, i32
  }
  func.func @transform_4(%arg0: i32) -> (i32, i32) {
    %c0_i32 = arith.constant 0 : i32
    %c0_i32_0 = arith.constant 0 : i32
    return %arg0, %c0_i32 : i32, i32
  }
  func.func @transform_5(%arg0: i32) -> (i32, i32) {
    %c0_i32 = arith.constant 0 : i32
    %c0_i32_0 = arith.constant 0 : i32
    return %arg0, %c0_i32 : i32, i32
  }
}

</mosaic_0001>

<bundles_post_ra>
// kernel: tpu_custom_call.1
= control target key start
LH: loop header
LB: loop body
LE: loop exit
PB: predicated region body
PF: predicated region fallthrough
CT: control target
= control target key end

     0   :  { %vm31_vm0 = vcmask 1043456   ;;  %v200_v2 = vmov 0.0   ;;  %vm201_vm1 = vmmov 0   ;;  %vm27_vm2 = vcmask 31744   ;;  %s264_s0 = inlined_call_operand.vmem [shape: f32[8,4], index: 0, kind: input, shape index: {}]   ;;  %s265_s1 = inlined_call_operand.vmem [shape: f32[4,11], index: 1, kind: input, shape index: {}]   ;;  %s266_s2 = inlined_call_operand.vmem [shape: f32[1,11], index: 2, kind: input, shape index: {}]   ;;  %s267_s3 = inlined_call_operand.hbm [shape: f32[8,6], index: 3, kind: output, shape index: {0}]   ;;  %s268_s4 = inlined_call_operand.vmem [shape: f32[8,3], index: 4, kind: output, shape index: {1}]   ;;  %s269_s5 = inlined_call_operand.vmem [shape: f32[8,2], index: 5, kind: output, shape index: {2}]  }
   0x1   :  { %v19_v0 = vld [vmem:[%s265_s1] sm:$0xf]  ;;  %162 = vmatprep.subr.mxu0 %v200_v2  ;;  %164 = vmatprep.mubr.msk.f32.mxu0 %vm201_vm1, %v200_v2 }
   0x2   :  { %v18_v1 = vld [vmem:[%s264_s0] sm:$0xff] }
   0x3   :  { %11 = vsyncpa [#allocation3], 0  ;;  %163 = vmatpush3.msk.msra.mxu0 %vm31_vm0, %v19_v0  ;;  %v157_v3 = vld [vmem:[%s266_s2] ss:$0 sm:$0xff]  ;;  %vm107_vm3 = vcmask 72752   ;;  %vm105_vm4 = vcmask 48128  }
   0x4   :  { %165 = vmatmul.mubr.msk.f32.vlgmr.msra.gmra.mrb[0].mxu0 %vm27_vm2, %v18_v1  ;;  %s202_s0 = smov 122   ;;  %vm118_vm5 = vcmask 23552   ;;  %s203_s1 = smov [#allocation2]  }
   0x5   :  { %s141_s2 = sshll.u32 %s203_s1, 4  ;;  %s142_s2 = int_to_ptr.vmem [resolvable:$true] %s141_s2 }
   0x6   :  { %s176_s24 = scalar_lea.vmem %s142_s2, 128  ;;  %p181_p1 = scmp.lt.s32.totalorder %s142_s2, %s142_s2 }
   0x7   :  { %p177_p0 = scmp.ne.s32.totalorder %s142_s2, %s176_s24  ;;  %p182_p2 = scmp.lt.s32.totalorder %s176_s24, %s176_s24 }
   0x9   :  { %p183_p3 = por %p182_p2, %p181_p1 }
   0xb   :  { %p184_p4 = pnand %p183_p3, %p177_p0 }
  0xd7   :  { %v101_v4 = vpop.f32.mrb[0].mxu0 }
  0xd8   :  { %v102_v5 = vadd.f32 %v157_v3, %v101_v4  ;;  %v166_v6 = vpop.f32.mrb[1].mxu0 }
  0xda   :  { %v108_v7 = vsel %vm107_vm3, %v102_v5, -inf  ;;  %106 = vst.msk [vmem:[#allocation2] sm:$0xff] %vm105_vm4, %v102_v5 }
  0xdb   :  { %109 = vmax.xlane.f32.xlu0 %v108_v7 }
 0x168   :  { %v110_v8 = vpop.xlane.xlu0 %109 }
 0x169   :  { %v111_v9 = vsub.f32 %v102_v5, %v110_v8 }
 0x16b   :  { %v112_v10 = vmul.f32 1.442695, %v111_v9 }
 0x16d   :  { %172 = vpow2.f32 %v112_v10 }
 0x177   :  { %v173_v11 = vpop.eup %172 }
 0x178   :  { %115 = vrot.lane.b32.xlu0 %v173_v11, %s202_s0 }
 0x1ea   :  { %v116_v12 = vpop.permute.xlu0 %115 }
 0x1eb   :  { %v119_v13 = vsel %vm118_vm5, %v116_v12, 0.0 }
 0x1ec   :  { %120 = vadd.xlane.f32.xlu1 %v119_v13 }
 0x279   :  { %v121_v14 = vpop.xlane.xlu1 %120 }
 0x27a   :  { %174 = vrcp.f32 %v121_v14 }
 0x27b   :  { %187 = shalt.err (!%p184_p4)
}
 0x27c   :  { %s188_s27 = scalar_lea.hbm %s267_s3, 128 }
 0x27d   :  { %p189_p5 = scmp.ne.s32.totalorder %s267_s3, %s188_s27  ;;  %p192_p6 = scmp.lt.u32.totalorder %s188_s27, %s267_s3 }
 0x27f   :  { %p194_p7 = pnand %p192_p6, %p189_p5 }
 0x281   :  { %197 = shalt.err (!%p194_p7)
}
 0x282   :  { %144 = dma.vmem_to_hbm [thread:$0]  %s142_s2, 128, %s267_s3, [#allocation3]   ;;  %vm133_vm6 = vcmask 15360  }
 0x283   :  { %s204_s9 = smov 119  }
 0x284   :  { %v175_v15 = vpop.eup %174 }
 0x285   :  { %v123_v16 = vmul.f32 %v175_v15, %v173_v11 }
 0x287   :  { %125 = vrot.lane.b32.xlu1 %v123_v16, %s202_s0 }
 0x28b   :  { %130 = vrot.lane.b32.xlu1 %v102_v5, %s204_s9 }
 0x2f9   :  { %v126_v17 = vpop.permute.xlu1 %125 }
 0x2fa   :  { %128 = vst.msk [vmem:[%s268_s4] sm:$0xff] %vm118_vm5, %v126_v17 }
 0x2fd   :  { %v131_v18 = vpop.permute.xlu1 %130 }
 0x2fe   :  { %134 = vst.msk [vmem:[%s269_s5] sm:$0xff] %vm133_vm6, %v131_v18 }
 0x2ff   :  { %198 = dma.done.wait [#allocation3], 128  }
 0x300   :  { %199 = vsyncadd [#allocation3], 4294967168 }
 0x301   :  { %156 = vsyncpa [#allocation3], 1 }

</bundles_post_ra>
